<compile_context>
chip_gen: v5e
topology: v5e:2x2
jax: 0.10.0
libtpu: 0.0.40
codegen_flags: <defaults>
</compile_context>

<pallas_src>
import functools

import jax
import jax.numpy as jnp
from jax.experimental import pallas as pl
from jax.experimental.pallas import tpu as pltpu


def _nll_loss_kernel(logp_ref, tgt_ref, o_ref, sum_ref, cnt_ref, *,
                     n_total, ignore_index, has_row_padding):
    i = pl.program_id(0)

    @pl.when(i == 0)
    def _init():
        sum_ref[...] = jnp.zeros_like(sum_ref)
        cnt_ref[...] = jnp.zeros_like(cnt_ref)

    logp = logp_ref[...]                       # (TN, C) native dtype (f32 / bf16)
    tgt = tgt_ref[...]                         # (TN, 1) int32 class indices
    tn, c = logp.shape

    # Row validity: ignore_index targets always masked; rows padded by pl.cdiv
    # masked only when padding can actually occur (static decision).
    valid_row = tgt != ignore_index                                  # (TN, 1) bool
    if has_row_padding:
        row = jax.lax.broadcasted_iota(jnp.int32, (tn, 1), 0) + i * tn
        valid_row = valid_row & (row < n_total)

    # Select-and-reduce gather: picked[r, k] = logp[r, k] iff k == tgt[r].
    col = jax.lax.broadcasted_iota(jnp.int32, (tn, c), 1)
    pick = (col == tgt) & valid_row                                  # (TN, C) bool
    picked = jnp.where(pick, logp, jnp.zeros_like(logp)).astype(jnp.float32)

    sum_ref[...] += jnp.sum(picked)                                  # f32 accumulation
    cnt_ref[...] += jnp.sum(valid_row.astype(jnp.float32))

    @pl.when(i == pl.num_programs(0) - 1)
    def _finalize():
        # mean over non-ignored targets, negated (F.nll_loss semantics).
        o_ref[...] = -sum_ref[...] / cnt_ref[...]


def _padded_row_bytes(c, itemsize):
    """Physical VMEM bytes per row of one pipeline buffer (logp tile + target tile)."""
    c_pad = ((c + 127) // 128) * 128
    logp_row = c_pad * itemsize
    tgt_row = 128 * 4                          # (TN, 1) int32 tile pads to 128 lanes
    return logp_row + tgt_row


def _pick_block_rows(n, c, itemsize):
    """Largest row tile fitting a ~8 MiB per-pipeline-buffer budget, sublane-aligned."""
    sub = max(8, 32 // itemsize)               # 8 for f32, 16 for bf16
    budget = 8 * 1024 * 1024                   # bytes per pipeline buffer (x2 for dbl-buf)
    tn = budget // _padded_row_bytes(c, itemsize)
    tn = (tn // sub) * sub
    if tn <= 0 or tn >= n:
        return n                               # single full-row block is always legal
    return tn


def set_loss(log_probs: jax.Array, target: jax.Array, *,
             ignore_index: int = -100, block_rows: int | None = None) -> jax.Array:
    """Pallas TPU equivalent of Set_loss()(input, target) == F.nll_loss(input, target)."""
    n, c = log_probs.shape
    itemsize = jnp.dtype(log_probs.dtype).itemsize
    sub = max(8, 32 // itemsize)

    if block_rows is None:
        tn = _pick_block_rows(n, c, itemsize)
    else:
        tn = min(int(block_rows), n)
        if tn < n:
            tn = max(sub, (tn // sub) * sub)
    num_blocks = pl.cdiv(n, tn)
    has_row_padding = (n % tn) != 0

    tgt2d = target.astype(jnp.int32).reshape(n, 1)

    # VMEM budget: double-buffered (logp tile + target tile) w/ padded layout + slack.
    rows_pad = ((tn + sub - 1) // sub) * sub
    per_buf = rows_pad * _padded_row_bytes(c, itemsize)
    vmem_limit = int(min(max(2 * per_buf + (2 << 20), 16 << 20), 48 << 20))

    kernel = functools.partial(_nll_loss_kernel, n_total=n,
                               ignore_index=ignore_index,
                               has_row_padding=has_row_padding)

    out = pl.pallas_call(
        kernel,
        out_shape=jax.ShapeDtypeStruct((1, 1), jnp.float32),
        grid_spec=pltpu.PrefetchScalarGridSpec(
            num_scalar_prefetch=0,
            grid=(num_blocks,),
            in_specs=[
                pl.BlockSpec((tn, c), lambda i: (i, 0)),
                pl.BlockSpec((tn, 1), lambda i: (i, 0)),
            ],
            out_specs=pl.BlockSpec((1, 1), lambda i: (0, 0)),
            scratch_shapes=[
                pltpu.VMEM((1, 1), jnp.float32),   # running sum of picked log-probs
                pltpu.VMEM((1, 1), jnp.float32),   # running count of valid targets
            ],
        ),
        compiler_params=pltpu.CompilerParams(
            dimension_semantics=("arbitrary",),    # grid axis is a reduction
            vmem_limit_bytes=vmem_limit,
        ),
    )(log_probs, tgt2d)
    return out[0, 0]


if __name__ == "__main__":
    key = jax.random.PRNGKey(0)
    k1, k2, k3, k4 = jax.random.split(key, 4)

    # Small shapes consistent with an NLL-loss head: batch=8 rows, 32 classes.
    N, C = 8, 32
    logits = jax.random.normal(k1, (N, C), dtype=jnp.float32)
    log_probs = jax.nn.log_softmax(logits, axis=-1)   # nll_loss expects log-probs
    target = jax.random.randint(k2, (N,), 0, C, dtype=jnp.int32)

    loss = set_loss(log_probs, target)
    jax.block_until_ready(loss)
    ref = -jnp.mean(log_probs[jnp.arange(N), target])
    assert jnp.allclose(loss, ref, atol=1e-5), (loss, ref)

    # Exercise the tiled + padded path: N not a multiple of the row tile.
    N2 = 13
    logits2 = jax.random.normal(k3, (N2, C), dtype=jnp.float32)
    log_probs2 = jax.nn.log_softmax(logits2, axis=-1)
    target2 = jax.random.randint(k4, (N2,), 0, C, dtype=jnp.int32)
    loss2 = set_loss(log_probs2, target2, block_rows=8)   # grid=(2,), padded last block
    jax.block_until_ready(loss2)
    ref2 = -jnp.mean(log_probs2[jnp.arange(N2), target2])
    assert jnp.allclose(loss2, ref2, atol=1e-5), (loss2, ref2)

    # ignore_index=-100 path: masked rows excluded from both sum and denominator.
    target3 = target2.at[0].set(-100).at[5].set(-100)
    loss3 = set_loss(log_probs2, target3, block_rows=8)
    jax.block_until_ready(loss3)
    valid3 = (target3 != -100)
    picked3 = log_probs2[jnp.arange(N2), jnp.where(valid3, target3, 0)] * valid3
    ref3 = -jnp.sum(picked3) / jnp.sum(valid3)
    assert jnp.allclose(loss3, ref3, atol=1e-5), (loss3, ref3)

    # Native bf16 path (no wrapper-side f32 upcast; f32 accumulation in-kernel).
    log_probs_bf16 = log_probs.astype(jnp.bfloat16)
    loss_bf16 = set_loss(log_probs_bf16, target)
    jax.block_until_ready(loss_bf16)
    ref_bf16 = -jnp.mean(log_probs_bf16.astype(jnp.float32)[jnp.arange(N), target])
    assert jnp.allclose(loss_bf16, ref_bf16, atol=2e-2), (loss_bf16, ref_bf16)

    print("KERNEL_OK")
</pallas_src>

<mosaic_0001>
module attributes {stable_mosaic.version = 11 : i64} {
  func.func @_nll_loss_kernel(%arg0: i32, %arg1: memref<8x32xf32, #tpu.memory_space<vmem>>, %arg2: memref<8x1xi32, #tpu.memory_space<vmem>>, %arg3: memref<1x1xf32, #tpu.memory_space<vmem>>, %arg4: memref<1x1xf32, #tpu.memory_space<vmem>>, %arg5: memref<1x1xf32, #tpu.memory_space<vmem>>) attributes {dimension_semantics = [#tpu.dimension_semantics<arbitrary>], iteration_bounds = array<i64: 1>, scalar_prefetch = 0 : i64, scratch_operands = 2 : i64, tpu.core_type = #tpu.core_type<tc>, window_params = [{transform_indices = @transform_0, window_bounds = array<i64: 8, 32>}, {transform_indices = @transform_1, window_bounds = array<i64: 8, 1>}, {pipeline_mode = #tpu.pipeline_mode<synchronous>, transform_indices = @transform_2, window_bounds = array<i64: 1, 1>}]} {
    %c0_i32 = arith.constant 0 : i32
    %0 = arith.cmpi eq, %arg0, %c0_i32 : i32
    %1 = arith.extui %0 : i1 to i32
    %c0_i32_0 = arith.constant 0 : i32
    %2 = arith.cmpi ne, %1, %c0_i32_0 : i32
    scf.if %2 {
      %cst_16 = arith.constant 0.000000e+00 : f32
      %35 = vector.broadcast %cst_16 : f32 to vector<1x1xf32>
      %c0_17 = arith.constant 0 : index
      %c0_18 = arith.constant 0 : index
      %36 = vector.load %arg4[%c0_17, %c0_18] : memref<1x1xf32, #tpu.memory_space<vmem>>, vector<1x1xf32>
      tpu.vector_store %arg4[%c0_17, %c0_18], %35 {strides = array<i32>} : memref<1x1xf32, #tpu.memory_space<vmem>>, vector<1x1xf32>,
      %cst_19 = arith.constant 0.000000e+00 : f32
      %37 = vector.broadcast %cst_19 : f32 to vector<1x1xf32>
      %c0_20 = arith.constant 0 : index
      %c0_21 = arith.constant 0 : index
      %38 = vector.load %arg5[%c0_20, %c0_21] : memref<1x1xf32, #tpu.memory_space<vmem>>, vector<1x1xf32>
      tpu.vector_store %arg5[%c0_20, %c0_21], %37 {strides = array<i32>} : memref<1x1xf32, #tpu.memory_space<vmem>>, vector<1x1xf32>,
    } else {
    }
    %c0 = arith.constant 0 : index
    %c0_1 = arith.constant 0 : index
    %3 = vector.load %arg1[%c0, %c0_1] : memref<8x32xf32, #tpu.memory_space<vmem>>, vector<8x32xf32>
    %c0_2 = arith.constant 0 : index
    %c0_3 = arith.constant 0 : index
    %4 = vector.load %arg2[%c0_2, %c0_3] : memref<8x1xi32, #tpu.memory_space<vmem>>, vector<8x1xi32>
    %c-100_i32 = arith.constant -100 : i32
    %5 = vector.broadcast %c-100_i32 : i32 to vector<8x1xi32>
    %6 = arith.cmpi ne, %4, %5 : vector<8x1xi32>
    %7 = tpu.iota {dimensions = array<i32: 1>} : vector<8x32xi32>
    %8 = vector.broadcast %4 : vector<8x1xi32> to vector<8x32xi32>
    %9 = arith.cmpi eq, %7, %8 : vector<8x32xi32>
    %10 = vector.broadcast %6 : vector<8x1xi1> to vector<8x32xi1>
    %11 = arith.andi %9, %10 : vector<8x32xi1>
    %cst = arith.constant 0.000000e+00 : f32
    %12 = vector.broadcast %cst : f32 to vector<8x32xf32>
    %13 = arith.select %11, %3, %12 : vector<8x32xi1>, vector<8x32xf32>
    %c0_4 = arith.constant 0 : index
    %c0_5 = arith.constant 0 : index
    %14 = vector.load %arg4[%c0_4, %c0_5] : memref<1x1xf32, #tpu.memory_space<vmem>>, vector<1x1xf32>
    %15 = vector.shape_cast %13 : vector<8x32xf32> to vector<1x8x32xf32>
    %cst_6 = arith.constant dense<0.000000e+00> : vector<1xf32>
    %16 = vector.multi_reduction <add>, %15, %cst_6 [1, 2] : vector<1x8x32xf32> to vector<1xf32>
    %17 = vector.shape_cast %16 : vector<1xf32> to vector<1x1x1xf32>
    %18 = vector.extract %17[0, 0, 0] : f32 from vector<1x1x1xf32>
    %19 = vector.broadcast %18 : f32 to vector<1x1xf32>
    %20 = arith.addf %14, %19 : vector<1x1xf32>
    %c0_7 = arith.constant 0 : index
    %c0_8 = arith.constant 0 : index
    %21 = vector.load %arg4[%c0_7, %c0_8] : memref<1x1xf32, #tpu.memory_space<vmem>>, vector<1x1xf32>
    tpu.vector_store %arg4[%c0_7, %c0_8], %20 {strides = array<i32>} : memref<1x1xf32, #tpu.memory_space<vmem>>, vector<1x1xf32>,
    %c0_9 = arith.constant 0 : index
    %c0_10 = arith.constant 0 : index
    %22 = vector.load %arg5[%c0_9, %c0_10] : memref<1x1xf32, #tpu.memory_space<vmem>>, vector<1x1xf32>
    %23 = arith.extui %6 : vector<8x1xi1> to vector<8x1xi32>
    %24 = arith.sitofp %23 : vector<8x1xi32> to vector<8x1xf32>
    %25 = vector.shape_cast %24 : vector<8x1xf32> to vector<1x8x1xf32>
    %cst_11 = arith.constant dense<0.000000e+00> : vector<1xf32>
    %26 = vector.multi_reduction <add>, %25, %cst_11 [1, 2] : vector<1x8x1xf32> to vector<1xf32>
    %27 = vector.shape_cast %26 : vector<1xf32> to vector<1x1x1xf32>
    %28 = vector.extract %27[0, 0, 0] : f32 from vector<1x1x1xf32>
    %29 = vector.broadcast %28 : f32 to vector<1x1xf32>
    %30 = arith.addf %22, %29 : vector<1x1xf32>
    %c0_12 = arith.constant 0 : index
    %c0_13 = arith.constant 0 : index
    %31 = vector.load %arg5[%c0_12, %c0_13] : memref<1x1xf32, #tpu.memory_space<vmem>>, vector<1x1xf32>
    tpu.vector_store %arg5[%c0_12, %c0_13], %30 {strides = array<i32>} : memref<1x1xf32, #tpu.memory_space<vmem>>, vector<1x1xf32>,
    %c0_i32_14 = arith.constant 0 : i32
    %32 = arith.cmpi eq, %arg0, %c0_i32_14 : i32
    %33 = arith.extui %32 : i1 to i32
    %c0_i32_15 = arith.constant 0 : i32
    %34 = arith.cmpi ne, %33, %c0_i32_15 : i32
    scf.if %34 {
      %c0_16 = arith.constant 0 : index
      %c0_17 = arith.constant 0 : index
      %35 = vector.load %arg4[%c0_16, %c0_17] : memref<1x1xf32, #tpu.memory_space<vmem>>, vector<1x1xf32>
      %cst_18 = arith.constant 0.000000e+00 : f32
      %36 = vector.broadcast %cst_18 : f32 to vector<1x1xf32>
      %37 = arith.subf %36, %35 : vector<1x1xf32>
      %c0_19 = arith.constant 0 : index
      %c0_20 = arith.constant 0 : index
      %38 = vector.load %arg5[%c0_19, %c0_20] : memref<1x1xf32, #tpu.memory_space<vmem>>, vector<1x1xf32>
      %39 = arith.divf %37, %38 : vector<1x1xf32>
      %c0_21 = arith.constant 0 : index
      %c0_22 = arith.constant 0 : index
      %40 = vector.load %arg3[%c0_21, %c0_22] : memref<1x1xf32, #tpu.memory_space<vmem>>, vector<1x1xf32>
      tpu.vector_store %arg3[%c0_21, %c0_22], %39 {strides = array<i32>} : memref<1x1xf32, #tpu.memory_space<vmem>>, vector<1x1xf32>,
    } else {
    }
    return
  }
  func.func @transform_0(%arg0: i32) -> (i32, i32) {
    %c0_i32 = arith.constant 0 : i32
    %c0_i32_0 = arith.constant 0 : i32
    return %arg0, %c0_i32 : i32, i32
  }
  func.func @transform_1(%arg0: i32) -> (i32, i32) {
    %c0_i32 = arith.constant 0 : i32
    %c0_i32_0 = arith.constant 0 : i32
    return %arg0, %c0_i32 : i32, i32
  }
  func.func @transform_2(%arg0: i32) -> (i32, i32) {
    %c0_i32 = arith.constant 0 : i32
    %c0_i32_0 = arith.constant 0 : i32
    %c0_i32_1 = arith.constant 0 : i32
    return %c0_i32, %c0_i32_0 : i32, i32
  }
}

</mosaic_0001>

<bundles_post_ra>
// kernel: tpu_custom_call.1
= control target key start
LH: loop header
LB: loop body
LE: loop exit
PB: predicated region body
PF: predicated region fallthrough
CT: control target
= control target key end

     0   :  { %s176_s0 = inlined_call_operand.vmem [shape: f32[8,32], index: 0, kind: input, shape index: {}]   ;;  %s177_s1 = inlined_call_operand.vmem [shape: s32[8,1], index: 1, kind: input, shape index: {}]   ;;  %s178_s2 = inlined_call_operand.hbm [shape: f32[1,1], index: 2, kind: output, shape index: {}]  }
   0x1   :  { %v20_v0 = vld [vmem:[%s177_s1] sm:$0xff] }
   0x2   :  { %7 = vsyncpa [#allocation5], 0  ;;  %v142_v1 = vmov 0   ;;  %vm21_vm0 = vcmp.ne.s32.totalorder %v20_v0, 4294967196  ;;  %vm16_vm1 = vcmask 0   ;;  %v143_v3 = vmov 0.0  }
   0x3   :  { %113 = vset.pattern.permute.xlu0 %v142_v1  ;;  %v28_v2 = vsel %vm21_vm0, 1, %v142_v1  ;;  %17 = vst.msk [vmem:[#allocation2] sm:$0x1] %vm16_vm1, %v143_v3  ;;  %v22_v5 = vlaneseq  ;;  %v19_v8 = vld [vmem:[%s176_s0] sm:$0xff]  ;;  %vm36_vm4 = vcmask 261120   ;;  %v105_v11 = vsel %vm21_vm0, 1.0, %v143_v3 }
   0x4   :  { %25 = vperm.xlu0 %113, %v20_v0   ;;  %18 = vst.msk [vmem:[#allocation3] sm:$0x1] %vm16_vm1, %v143_v3  ;;  %vm53_vm6 = vcmask 7168   ;;  %s144_s13 = smov [#allocation4]   ;;  %s96_s17 = sshll.u32 %s178_s2, 4  ;;  %s97_s17 = int_to_ptr.hbm [resolvable:$true] %s96_s17 }
   0x5   :  { %v23_v6 = vand.u32 127, %v22_v5  ;;  %v54_v12 = vsel %vm53_vm6, %v105_v11, 0.0  ;;  %s94_s14 = sshll.u32 %s144_s13, 4  ;;  %s95_s14 = int_to_ptr.vmem [resolvable:$true] %s94_s14 }
   0xa   :  { %v35_v27 = vld [vmem:[#allocation2] sm:$0x1] }
   0xb   :  { %v51_v30 = vld [vmem:[#allocation3] sm:$0x1] }
   0xc   :  { %30 = vperm.xlu0 %113, %v28_v2  }
  0x76   :  { %v26_v4 = vpop.permute.xlu0 %25 }
  0x77   :  { %vm27_vm2 = vcmp.eq.s32.totalorder %v23_v6, %v26_v4 }
  0x7e   :  { %v31_v7 = vpop.permute.xlu0 %30 }
  0x7f   :  { %vm32_vm3 = vcmp.eq.s32.totalorder %v31_v7, 1 }
  0x80   :  { %vm33_vm5 = vmand %vm27_vm2, %vm32_vm3 }
  0x81   :  { %v34_v9 = vsel %vm33_vm5, %v19_v8, 0.0 }
  0x82   :  { %v37_v10 = vsel %vm36_vm4, %v34_v9, 0.0 }
  0x83   :  { %38 = vadd.xlane.f32.xlu1 %v37_v10 }
  0x8b   :  { %55 = vadd.xlane.f32.xlu1 %v54_v12 }
  0xf6   :  { %v39_v13 = vpop.xlane.xlu1 %38 }
  0xf7   :  { %v40_v14 = vrot.slane %v39_v13, 4 }
  0xf9   :  { %v41_v15 = vadd.f32 %v40_v14, %v39_v13 }
  0xfb   :  { %v42_v16 = vrot.slane %v41_v15, 2 }
  0xfd   :  { %v43_v17 = vadd.f32 %v42_v16, %v41_v15 }
  0xfe   :  { %v56_v18 = vpop.xlane.xlu1 %55 }
  0xff   :  { %v57_v19 = vrot.slane %v56_v18, 4  ;;  %v44_v20 = vrot.slane %v43_v17, 1 }
 0x101   :  { %v58_v21 = vadd.f32 %v57_v19, %v56_v18  ;;  %v45_v22 = vadd.f32 %v44_v20, %v43_v17 }
 0x103   :  { %v59_v23 = vrot.slane %v58_v21, 2  ;;  %106 = vpush %v45_v22 }
 0x105   :  { %v60_v24 = vadd.f32 %v59_v23, %v58_v21 }
 0x107   :  { %v61_v25 = vrot.slane %v60_v24, 1 }
 0x109   :  { %v62_v26 = vadd.f32 %v61_v25, %v60_v24 }
 0x10b   :  { %108 = vpush %v62_v26 }
 0x134   :  { %s107_s0 = spop %106 }
 0x135   :  { %v47_v28 = vstv %s107_s0 }
 0x136   :  { %v48_v29 = vadd.f32 %v47_v28, %v35_v27 }
 0x138   :  { %50 = vst.msk [vmem:[#allocation2] sm:$0x1] %vm16_vm1, %v48_v29 }
 0x13c   :  { %s109_s12 = spop %108 }
 0x13d   :  { %v64_v31 = vstv %s109_s12 }
 0x13e   :  { %v65_v32 = vadd.f32 %v64_v31, %v51_v30 }
 0x13f   :  { %v70_v40 = vld [vmem:[#allocation2] sm:$0x1] }
 0x140   :  { %66 = vst.msk [vmem:[#allocation3] sm:$0x1] %vm16_vm1, %v65_v32  ;;  %v71_v43 = vsub.f32 0.0, %v70_v40 }
 0x147   :  { %v72_v33 = vld [vmem:[#allocation3] sm:$0x1] }
 0x148   :  { %114 = vrcp.f32 %v72_v33  ;;  %v84_v37 = vand.u32 2147483648, %v72_v33  ;;  %v82_v39 = vand.u32 2147483647, %v72_v33  ;;  %vm78_vm8 = vweird.f32 %v72_v33 }
 0x14a   :  { %v85_v42 = vor.u32 1.1754944e-38, %v84_v37  ;;  %vm83_vm10 = vcmp.eq.f32.partialorder %v82_v39, 8.507059e+37 }
 0x14e   :  { %v115_v34 = vpop.eup %114 }
 0x14f   :  { %v74_v35 = vmul.f32 %v115_v34, %v72_v33  ;;  %vm79_vm7 = vweird.f32 %v115_v34 }
 0x150   :  { %vm80_vm9 = vmor %vm78_vm8, %vm79_vm7 }
 0x151   :  { %v75_v36 = vsub.f32 1.0, %v74_v35 }
 0x153   :  { %v76_v38 = vmul.f32 %v115_v34, %v75_v36 }
 0x155   :  { %v77_v41 = vadd.f32 %v115_v34, %v76_v38 }
 0x157   :  { %v81_v44 = vsel %vm80_vm9, %v115_v34, %v77_v41 }
 0x158   :  { %v86_v45 = vsel %vm83_vm10, %v85_v42, %v81_v44 }
 0x159   :  { %v87_v46 = vmul.f32 %v86_v45, %v71_v43 }
 0x15b   :  { %88 = vst.msk [vmem:[#allocation4] sm:$0x1] %vm16_vm1, %v87_v46 }
 0x15c   :  { %99 = dma.vmem_to_hbm [thread:$0]  %s95_s14, 16, %s97_s17, [#allocation5]  }
 0x15d   :  { %140 = dma.done.wait [#allocation5], 16  }
 0x15e   :  { %141 = vsyncadd [#allocation5], 4294967280 }
 0x15f   :  { %104 = vsyncpa [#allocation5], 1 }

</bundles_post_ra>
